<compile_context>
chip_gen: v6e
topology: v6e:2x2x1
jax: 0.10.0
libtpu: 0.0.40
codegen_flags: <defaults>
</compile_context>

<pallas_src>
import functools

import jax
import jax.numpy as jnp
from jax.experimental import pallas as pl
from jax.experimental.pallas import tpu as pltpu

LEAKY_SLOPE = 0.01   # nn.LeakyReLU default negative_slope
BN_EPS = 1e-5        # nn.BatchNorm2d default eps


# ----------------------------------------------------------------------------
# Fused kernel: (conv3x3 pad=1 no-bias -> folded BN -> LeakyReLU) x 2, per batch.
# Activations live as (C, H*W) with the flattened spatial dim on lanes.
# ----------------------------------------------------------------------------
def _double_conv_kernel(x_ref, m_ref, w0_ref, s0_ref, b0_ref,
                        w1_ref, s1_ref, b1_ref, o_ref, *, H, W):
    HW = H * W
    cdtype = x_ref.dtype                       # compute dtype (f32 or bf16)

    masks = m_ref[...]                         # (2, HW) in compute dtype
    mask_p = masks[0:1, :]                     # 0 where flat col % W == 0     (dx = +1)
    mask_m = masks[1:2, :]                     # 0 where flat col % W == W - 1 (dx = -1)

    def extend(v):
        # Pad (W+1) zero lanes on both sides of the flattened spatial axis so that
        # every 3x3 tap becomes a plain static lane-slice; the zeros also provide
        # the top/bottom rows of the 'same' padding for free.
        z = jnp.zeros((v.shape[0], W + 1), v.dtype)
        return jnp.concatenate([z, v, z], axis=1)            # (C, HW + 2W + 2)

    def conv_bn_lrelu(v, w_ref, s_ref, b_ref):
        # v: (Cin, HW) in compute dtype.
        ext = {
            0: extend(v),
            1: extend(v * mask_p),    # dx=+1: source column 0 is out of range -> 0
            -1: extend(v * mask_m),   # dx=-1: source column W-1 is out of range -> 0
        }
        taps = []
        for k in range(9):                                   # static unroll
            dy, dx = k // 3 - 1, k % 3 - 1
            off = (W + 1) + dy * W + dx                      # static, in [0, 2W+2]
            taps.append(ext[dx][:, off:off + HW])            # (Cin, HW)
        patches = jnp.concatenate(taps, axis=0)              # (9*Cin, HW): im2col, K on sublanes
        y = jnp.dot(w_ref[...], patches,
                    preferred_element_type=jnp.float32)      # (Cout, HW), f32 accumulation
        y = y * s_ref[...] + b_ref[...]                       # folded BN (eval mode), f32
        return jnp.where(y >= 0.0, y, LEAKY_SLOPE * y)        # LeakyReLU

    x = x_ref[0]                                              # (Cin, HW)
    h = conv_bn_lrelu(x, w0_ref, s0_ref, b0_ref)              # (Cmid, HW) f32, stays on-chip
    y = conv_bn_lrelu(h.astype(cdtype), w1_ref, s1_ref, b1_ref)   # (Cout, HW) f32
    o_ref[0] = y.astype(o_ref.dtype)                          # lane-dense store (HW lanes)


def double_conv_forward(params, x_nchw, compute_dtype=jnp.float32):
    """DoubleConv forward: (B, Cin, H, W) -> (B, Cout, H, W), float32 output."""
    B, Cin, H, W = x_nchw.shape
    w0, w1 = params["c0_w"], params["c1_w"]
    Cmid, Cout = w0.shape[0], w1.shape[0]
    HW = H * W   # best performance when H*W is a multiple of 128 (lane-dense)

    # Contiguous reshape only (no transpose / no HBM layout pass).
    x = x_nchw.reshape(B, Cin, HW).astype(compute_dtype)

    # torch conv weight (Co, Ci, 3, 3) -> (Co, 9*Ci); row index = (ky*3+kx)*Ci + ci,
    # matching the tap order used to build `patches` in the kernel.
    w0f = jnp.transpose(w0, (0, 2, 3, 1)).reshape(Cmid, 9 * Cin).astype(compute_dtype)
    w1f = jnp.transpose(w1, (0, 2, 3, 1)).reshape(Cout, 9 * Cmid).astype(compute_dtype)

    s0 = params["bn0_scale"].reshape(Cmid, 1).astype(jnp.float32)
    b0 = params["bn0_bias"].reshape(Cmid, 1).astype(jnp.float32)
    s1 = params["bn1_scale"].reshape(Cout, 1).astype(jnp.float32)
    b1 = params["bn1_bias"].reshape(Cout, 1).astype(jnp.float32)

    # Column-validity masks for the horizontal taps (built once, tiny).
    col = jnp.arange(HW, dtype=jnp.int32) % W
    masks = jnp.stack([(col != 0), (col != W - 1)], axis=0).astype(compute_dtype)  # (2, HW)

    kern = functools.partial(_double_conv_kernel, H=H, W=W)
    out = pl.pallas_call(
        kern,
        out_shape=jax.ShapeDtypeStruct((B, Cout, HW), jnp.float32),
        grid_spec=pltpu.PrefetchScalarGridSpec(
            num_scalar_prefetch=0,
            grid=(B,),
            in_specs=[
                pl.BlockSpec((1, Cin, HW), lambda b: (b, 0, 0)),
                pl.BlockSpec((2, HW), lambda b: (0, 0)),
                pl.BlockSpec((Cmid, 9 * Cin), lambda b: (0, 0)),
                pl.BlockSpec((Cmid, 1), lambda b: (0, 0)),
                pl.BlockSpec((Cmid, 1), lambda b: (0, 0)),
                pl.BlockSpec((Cout, 9 * Cmid), lambda b: (0, 0)),
                pl.BlockSpec((Cout, 1), lambda b: (0, 0)),
                pl.BlockSpec((Cout, 1), lambda b: (0, 0)),
            ],
            out_specs=pl.BlockSpec((1, Cout, HW), lambda b: (b, 0, 0)),
        ),
        compiler_params=pltpu.CompilerParams(
            dimension_semantics=("parallel",),
            vmem_limit_bytes=32 * 1024 * 1024,
        ),
    )(x, masks, w0f, s0, b0, w1f, s1, b1)

    return out.reshape(B, Cout, H, W)


# ----------------------------------------------------------------------------
# Pure-JAX reference (numerical check)
# ----------------------------------------------------------------------------
def ref_forward(params, x_nchw):
    h = x_nchw.astype(jnp.float32)
    for wk, sk, bk in (("c0_w", "bn0_scale", "bn0_bias"),
                       ("c1_w", "bn1_scale", "bn1_bias")):
        h = jax.lax.conv_general_dilated(
            h, params[wk].astype(jnp.float32), (1, 1), "SAME",
            dimension_numbers=("NCHW", "OIHW", "NCHW"),
            precision=jax.lax.Precision.HIGHEST)
        h = h * params[sk][None, :, None, None] + params[bk][None, :, None, None]
        h = jnp.where(h >= 0, h, LEAKY_SLOPE * h)
    return h


# ----------------------------------------------------------------------------
if __name__ == "__main__":
    key = jax.random.PRNGKey(0)
    ks = jax.random.split(key, 12)

    B, Cin, H, W = 2, 4, 16, 16
    Cmid = 8          # mid_channels (defaults to out_channels in the module)
    Cout = 8

    x = jax.random.normal(ks[0], (B, Cin, H, W), jnp.float32)

    def bn_fold(gamma, beta, mean, var):
        s = gamma / jnp.sqrt(var + BN_EPS)
        return s, beta - mean * s

    g0 = 1.0 + 0.1 * jax.random.normal(ks[3], (Cmid,), jnp.float32)
    be0 = 0.1 * jax.random.normal(ks[4], (Cmid,), jnp.float32)
    m0 = 0.1 * jax.random.normal(ks[5], (Cmid,), jnp.float32)
    v0 = 1.0 + 0.1 * jnp.abs(jax.random.normal(ks[6], (Cmid,), jnp.float32))
    g1 = 1.0 + 0.1 * jax.random.normal(ks[7], (Cout,), jnp.float32)
    be1 = 0.1 * jax.random.normal(ks[8], (Cout,), jnp.float32)
    m1 = 0.1 * jax.random.normal(ks[9], (Cout,), jnp.float32)
    v1 = 1.0 + 0.1 * jnp.abs(jax.random.normal(ks[10], (Cout,), jnp.float32))
    s0, o0 = bn_fold(g0, be0, m0, v0)
    s1, o1 = bn_fold(g1, be1, m1, v1)

    params = {
        # nn.Conv2d(Cin, Cmid, 3, padding=1, bias=False) / nn.Conv2d(Cmid, Cout, ...)
        "c0_w": 0.1 * jax.random.normal(ks[1], (Cmid, Cin, 3, 3), jnp.float32),
        "c1_w": 0.1 * jax.random.normal(ks[2], (Cout, Cmid, 3, 3), jnp.float32),
        "bn0_scale": s0, "bn0_bias": o0,
        "bn1_scale": s1, "bn1_bias": o1,
    }

    ref = jax.block_until_ready(ref_forward(params, x))

    # f32 MXU path: tight check.
    out_f32 = jax.block_until_ready(double_conv_forward(params, x, jnp.float32))
    assert out_f32.shape == (B, Cout, H, W), out_f32.shape
    err32 = float(jnp.max(jnp.abs(out_f32 - ref)))
    assert jnp.allclose(out_f32, ref, atol=5e-4, rtol=5e-4), err32

    # bf16 MXU path (fast path on v6e/v7x): loose tolerance for bf16 operand rounding.
    out_bf16 = jax.block_until_ready(double_conv_forward(params, x, jnp.bfloat16))
    errbf = float(jnp.max(jnp.abs(out_bf16 - ref)))
    assert jnp.allclose(out_bf16, ref, atol=5e-2, rtol=5e-2), errbf

    print("KERNEL_OK")
</pallas_src>

<mosaic_0001>
module attributes {stable_mosaic.version = 11 : i64} {
  func.func @_double_conv_kernel(%arg0: i32, %arg1: memref<1x4x256xf32, #tpu.memory_space<vmem>>, %arg2: memref<2x256xf32, #tpu.memory_space<vmem>>, %arg3: memref<8x36xf32, #tpu.memory_space<vmem>>, %arg4: memref<8x1xf32, #tpu.memory_space<vmem>>, %arg5: memref<8x1xf32, #tpu.memory_space<vmem>>, %arg6: memref<8x72xf32, #tpu.memory_space<vmem>>, %arg7: memref<8x1xf32, #tpu.memory_space<vmem>>, %arg8: memref<8x1xf32, #tpu.memory_space<vmem>>, %arg9: memref<1x8x256xf32, #tpu.memory_space<vmem>>) attributes {dimension_semantics = [#tpu.dimension_semantics<parallel>], iteration_bounds = array<i64: 2>, scalar_prefetch = 0 : i64, scratch_operands = 0 : i64, tpu.core_type = #tpu.core_type<tc>, window_params = [{transform_indices = @transform_0, window_bounds = array<i64: 1, 4, 256>}, {pipeline_mode = #tpu.pipeline_mode<synchronous>, transform_indices = @transform_1, window_bounds = array<i64: 2, 256>}, {pipeline_mode = #tpu.pipeline_mode<synchronous>, transform_indices = @transform_2, window_bounds = array<i64: 8, 36>}, {pipeline_mode = #tpu.pipeline_mode<synchronous>, transform_indices = @transform_3, window_bounds = array<i64: 8, 1>}, {pipeline_mode = #tpu.pipeline_mode<synchronous>, transform_indices = @transform_4, window_bounds = array<i64: 8, 1>}, {pipeline_mode = #tpu.pipeline_mode<synchronous>, transform_indices = @transform_5, window_bounds = array<i64: 8, 72>}, {pipeline_mode = #tpu.pipeline_mode<synchronous>, transform_indices = @transform_6, window_bounds = array<i64: 8, 1>}, {pipeline_mode = #tpu.pipeline_mode<synchronous>, transform_indices = @transform_7, window_bounds = array<i64: 8, 1>}, {transform_indices = @transform_8, window_bounds = array<i64: 1, 8, 256>}]} {
    %c0 = arith.constant 0 : index
    %c0_0 = arith.constant 0 : index
    %0 = vector.load %arg2[%c0, %c0_0] : memref<2x256xf32, #tpu.memory_space<vmem>>, vector<2x256xf32>
    %1 = vector.extract_strided_slice %0 {offsets = [0, 0], sizes = [1, 256], strides = [1, 1]} : vector<2x256xf32> to vector<1x256xf32>
    %2 = vector.extract_strided_slice %0 {offsets = [1, 0], sizes = [1, 256], strides = [1, 1]} : vector<2x256xf32> to vector<1x256xf32>
    %c0_1 = arith.constant 0 : index
    %c0_2 = arith.constant 0 : index
    %c0_3 = arith.constant 0 : index
    %3 = vector.load %arg1[%c0_1, %c0_2, %c0_3] : memref<1x4x256xf32, #tpu.memory_space<vmem>>, vector<1x4x256xf32>
    %4 = vector.shape_cast %3 : vector<1x4x256xf32> to vector<4x256xf32>
    %cst = arith.constant 0.000000e+00 : f32
    %5 = vector.broadcast %cst : f32 to vector<4x17xf32>
    %6 = tpu.concatenate %5, %4, %5 in 1 : vector<4x17xf32>, vector<4x256xf32>, vector<4x17xf32> -> vector<4x290xf32>
    %7 = vector.broadcast %1 : vector<1x256xf32> to vector<4x256xf32>
    %8 = arith.mulf %4, %7 : vector<4x256xf32>
    %cst_4 = arith.constant 0.000000e+00 : f32
    %9 = vector.broadcast %cst_4 : f32 to vector<4x17xf32>
    %10 = tpu.concatenate %9, %8, %9 in 1 : vector<4x17xf32>, vector<4x256xf32>, vector<4x17xf32> -> vector<4x290xf32>
    %11 = vector.broadcast %2 : vector<1x256xf32> to vector<4x256xf32>
    %12 = arith.mulf %4, %11 : vector<4x256xf32>
    %cst_5 = arith.constant 0.000000e+00 : f32
    %13 = vector.broadcast %cst_5 : f32 to vector<4x17xf32>
    %14 = tpu.concatenate %13, %12, %13 in 1 : vector<4x17xf32>, vector<4x256xf32>, vector<4x17xf32> -> vector<4x290xf32>
    %15 = vector.extract_strided_slice %14 {offsets = [0, 0], sizes = [4, 256], strides = [1, 1]} : vector<4x290xf32> to vector<4x256xf32>
    %16 = vector.extract_strided_slice %6 {offsets = [0, 1], sizes = [4, 256], strides = [1, 1]} : vector<4x290xf32> to vector<4x256xf32>
    %17 = vector.extract_strided_slice %10 {offsets = [0, 2], sizes = [4, 256], strides = [1, 1]} : vector<4x290xf32> to vector<4x256xf32>
    %18 = vector.extract_strided_slice %14 {offsets = [0, 16], sizes = [4, 256], strides = [1, 1]} : vector<4x290xf32> to vector<4x256xf32>
    %19 = vector.extract_strided_slice %6 {offsets = [0, 17], sizes = [4, 256], strides = [1, 1]} : vector<4x290xf32> to vector<4x256xf32>
    %20 = vector.extract_strided_slice %10 {offsets = [0, 18], sizes = [4, 256], strides = [1, 1]} : vector<4x290xf32> to vector<4x256xf32>
    %21 = vector.extract_strided_slice %14 {offsets = [0, 32], sizes = [4, 256], strides = [1, 1]} : vector<4x290xf32> to vector<4x256xf32>
    %22 = vector.extract_strided_slice %6 {offsets = [0, 33], sizes = [4, 256], strides = [1, 1]} : vector<4x290xf32> to vector<4x256xf32>
    %23 = vector.extract_strided_slice %10 {offsets = [0, 34], sizes = [4, 256], strides = [1, 1]} : vector<4x290xf32> to vector<4x256xf32>
    %24 = tpu.concatenate %15, %16, %17, %18, %19, %20, %21, %22, %23 in 0 : vector<4x256xf32>, vector<4x256xf32>, vector<4x256xf32>, vector<4x256xf32>, vector<4x256xf32>, vector<4x256xf32>, vector<4x256xf32>, vector<4x256xf32>, vector<4x256xf32> -> vector<36x256xf32>
    %c0_6 = arith.constant 0 : index
    %c0_7 = arith.constant 0 : index
    %25 = vector.load %arg3[%c0_6, %c0_7] : memref<8x36xf32, #tpu.memory_space<vmem>>, vector<8x36xf32>
    %cst_8 = arith.constant dense<0.000000e+00> : vector<8x256xf32>
    %26 = tpu.matmul %25, %24, %cst_8 {dimension_numbers = #tpu.dot_dimension_numbers<[1], [0], [0], [1], [0, 0, 1, 1], [], []>} : vector<8x36xf32>, vector<36x256xf32>, vector<8x256xf32> -> vector<8x256xf32>
    %c0_9 = arith.constant 0 : index
    %c0_10 = arith.constant 0 : index
    %27 = vector.load %arg4[%c0_9, %c0_10] : memref<8x1xf32, #tpu.memory_space<vmem>>, vector<8x1xf32>
    %28 = vector.broadcast %27 : vector<8x1xf32> to vector<8x256xf32>
    %29 = arith.mulf %26, %28 : vector<8x256xf32>
    %c0_11 = arith.constant 0 : index
    %c0_12 = arith.constant 0 : index
    %30 = vector.load %arg5[%c0_11, %c0_12] : memref<8x1xf32, #tpu.memory_space<vmem>>, vector<8x1xf32>
    %31 = vector.broadcast %30 : vector<8x1xf32> to vector<8x256xf32>
    %32 = arith.addf %29, %31 : vector<8x256xf32>
    %cst_13 = arith.constant 0.000000e+00 : f32
    %33 = vector.broadcast %cst_13 : f32 to vector<8x256xf32>
    %34 = arith.cmpf oge, %32, %33 : vector<8x256xf32>
    %cst_14 = arith.constant 0.00999999977 : f32
    %35 = vector.broadcast %cst_14 : f32 to vector<8x256xf32>
    %36 = arith.mulf %35, %32 : vector<8x256xf32>
    %37 = arith.select %34, %32, %36 : vector<8x256xi1>, vector<8x256xf32>
    %cst_15 = arith.constant 0.000000e+00 : f32
    %38 = vector.broadcast %cst_15 : f32 to vector<8x17xf32>
    %39 = tpu.concatenate %38, %37, %38 in 1 : vector<8x17xf32>, vector<8x256xf32>, vector<8x17xf32> -> vector<8x290xf32>
    %40 = vector.broadcast %1 : vector<1x256xf32> to vector<8x256xf32>
    %41 = arith.mulf %37, %40 : vector<8x256xf32>
    %cst_16 = arith.constant 0.000000e+00 : f32
    %42 = vector.broadcast %cst_16 : f32 to vector<8x17xf32>
    %43 = tpu.concatenate %42, %41, %42 in 1 : vector<8x17xf32>, vector<8x256xf32>, vector<8x17xf32> -> vector<8x290xf32>
    %44 = vector.broadcast %2 : vector<1x256xf32> to vector<8x256xf32>
    %45 = arith.mulf %37, %44 : vector<8x256xf32>
    %cst_17 = arith.constant 0.000000e+00 : f32
    %46 = vector.broadcast %cst_17 : f32 to vector<8x17xf32>
    %47 = tpu.concatenate %46, %45, %46 in 1 : vector<8x17xf32>, vector<8x256xf32>, vector<8x17xf32> -> vector<8x290xf32>
    %48 = vector.extract_strided_slice %47 {offsets = [0, 0], sizes = [8, 256], strides = [1, 1]} : vector<8x290xf32> to vector<8x256xf32>
    %49 = vector.extract_strided_slice %39 {offsets = [0, 1], sizes = [8, 256], strides = [1, 1]} : vector<8x290xf32> to vector<8x256xf32>
    %50 = vector.extract_strided_slice %43 {offsets = [0, 2], sizes = [8, 256], strides = [1, 1]} : vector<8x290xf32> to vector<8x256xf32>
    %51 = vector.extract_strided_slice %47 {offsets = [0, 16], sizes = [8, 256], strides = [1, 1]} : vector<8x290xf32> to vector<8x256xf32>
    %52 = vector.extract_strided_slice %39 {offsets = [0, 17], sizes = [8, 256], strides = [1, 1]} : vector<8x290xf32> to vector<8x256xf32>
    %53 = vector.extract_strided_slice %43 {offsets = [0, 18], sizes = [8, 256], strides = [1, 1]} : vector<8x290xf32> to vector<8x256xf32>
    %54 = vector.extract_strided_slice %47 {offsets = [0, 32], sizes = [8, 256], strides = [1, 1]} : vector<8x290xf32> to vector<8x256xf32>
    %55 = vector.extract_strided_slice %39 {offsets = [0, 33], sizes = [8, 256], strides = [1, 1]} : vector<8x290xf32> to vector<8x256xf32>
    %56 = vector.extract_strided_slice %43 {offsets = [0, 34], sizes = [8, 256], strides = [1, 1]} : vector<8x290xf32> to vector<8x256xf32>
    %57 = tpu.concatenate %48, %49, %50, %51, %52, %53, %54, %55, %56 in 0 : vector<8x256xf32>, vector<8x256xf32>, vector<8x256xf32>, vector<8x256xf32>, vector<8x256xf32>, vector<8x256xf32>, vector<8x256xf32>, vector<8x256xf32>, vector<8x256xf32> -> vector<72x256xf32>
    %c0_18 = arith.constant 0 : index
    %c0_19 = arith.constant 0 : index
    %58 = vector.load %arg6[%c0_18, %c0_19] : memref<8x72xf32, #tpu.memory_space<vmem>>, vector<8x72xf32>
    %cst_20 = arith.constant dense<0.000000e+00> : vector<8x256xf32>
    %59 = tpu.matmul %58, %57, %cst_20 {dimension_numbers = #tpu.dot_dimension_numbers<[1], [0], [0], [1], [0, 0, 1, 1], [], []>} : vector<8x72xf32>, vector<72x256xf32>, vector<8x256xf32> -> vector<8x256xf32>
    %c0_21 = arith.constant 0 : index
    %c0_22 = arith.constant 0 : index
    %60 = vector.load %arg7[%c0_21, %c0_22] : memref<8x1xf32, #tpu.memory_space<vmem>>, vector<8x1xf32>
    %61 = vector.broadcast %60 : vector<8x1xf32> to vector<8x256xf32>
    %62 = arith.mulf %59, %61 : vector<8x256xf32>
    %c0_23 = arith.constant 0 : index
    %c0_24 = arith.constant 0 : index
    %63 = vector.load %arg8[%c0_23, %c0_24] : memref<8x1xf32, #tpu.memory_space<vmem>>, vector<8x1xf32>
    %64 = vector.broadcast %63 : vector<8x1xf32> to vector<8x256xf32>
    %65 = arith.addf %62, %64 : vector<8x256xf32>
    %cst_25 = arith.constant 0.000000e+00 : f32
    %66 = vector.broadcast %cst_25 : f32 to vector<8x256xf32>
    %67 = arith.cmpf oge, %65, %66 : vector<8x256xf32>
    %cst_26 = arith.constant 0.00999999977 : f32
    %68 = vector.broadcast %cst_26 : f32 to vector<8x256xf32>
    %69 = arith.mulf %68, %65 : vector<8x256xf32>
    %70 = arith.select %67, %65, %69 : vector<8x256xi1>, vector<8x256xf32>
    %c0_27 = arith.constant 0 : index
    %c0_28 = arith.constant 0 : index
    %c0_29 = arith.constant 0 : index
    %71 = vector.load %arg9[%c0_27, %c0_28, %c0_29] : memref<1x8x256xf32, #tpu.memory_space<vmem>>, vector<1x8x256xf32>
    %72 = vector.shape_cast %71 : vector<1x8x256xf32> to vector<8x256xf32>
    %73 = vector.shape_cast %70 : vector<8x256xf32> to vector<1x8x256xf32>
    tpu.vector_store %arg9[%c0_27, %c0_28, %c0_29], %73 {strides = array<i32>} : memref<1x8x256xf32, #tpu.memory_space<vmem>>, vector<1x8x256xf32>,
    return
  }
  func.func @transform_0(%arg0: i32) -> (i32, i32, i32) {
    %c0_i32 = arith.constant 0 : i32
    %c0_i32_0 = arith.constant 0 : i32
    %c0_i32_1 = arith.constant 0 : i32
    return %arg0, %c0_i32, %c0_i32_0 : i32, i32, i32
  }
  func.func @transform_1(%arg0: i32) -> (i32, i32) {
    %c0_i32 = arith.constant 0 : i32
    %c0_i32_0 = arith.constant 0 : i32
    %c0_i32_1 = arith.constant 0 : i32
    return %c0_i32, %c0_i32_0 : i32, i32
  }
  func.func @transform_2(%arg0: i32) -> (i32, i32) {
    %c0_i32 = arith.constant 0 : i32
    %c0_i32_0 = arith.constant 0 : i32
    %c0_i32_1 = arith.constant 0 : i32
    return %c0_i32, %c0_i32_0 : i32, i32
  }
  func.func @transform_3(%arg0: i32) -> (i32, i32) {
    %c0_i32 = arith.constant 0 : i32
    %c0_i32_0 = arith.constant 0 : i32
    %c0_i32_1 = arith.constant 0 : i32
    return %c0_i32, %c0_i32_0 : i32, i32
  }
  func.func @transform_4(%arg0: i32) -> (i32, i32) {
    %c0_i32 = arith.constant 0 : i32
    %c0_i32_0 = arith.constant 0 : i32
    %c0_i32_1 = arith.constant 0 : i32
    return %c0_i32, %c0_i32_0 : i32, i32
  }
  func.func @transform_5(%arg0: i32) -> (i32, i32) {
    %c0_i32 = arith.constant 0 : i32
    %c0_i32_0 = arith.constant 0 : i32
    %c0_i32_1 = arith.constant 0 : i32
    return %c0_i32, %c0_i32_0 : i32, i32
  }
  func.func @transform_6(%arg0: i32) -> (i32, i32) {
    %c0_i32 = arith.constant 0 : i32
    %c0_i32_0 = arith.constant 0 : i32
    %c0_i32_1 = arith.constant 0 : i32
    return %c0_i32, %c0_i32_0 : i32, i32
  }
  func.func @transform_7(%arg0: i32) -> (i32, i32) {
    %c0_i32 = arith.constant 0 : i32
    %c0_i32_0 = arith.constant 0 : i32
    %c0_i32_1 = arith.constant 0 : i32
    return %c0_i32, %c0_i32_0 : i32, i32
  }
  func.func @transform_8(%arg0: i32) -> (i32, i32, i32) {
    %c0_i32 = arith.constant 0 : i32
    %c0_i32_0 = arith.constant 0 : i32
    %c0_i32_1 = arith.constant 0 : i32
    return %arg0, %c0_i32, %c0_i32_0 : i32, i32, i32
  }
}

</mosaic_0001>

<bundles_post_ra>
// kernel: tpu_custom_call.1
= control target key start
LH: loop header
LB: loop body
LE: loop exit
PB: predicated region body
PF: predicated region fallthrough
CT: control target
= control target key end

     0   :  { %13 = vsyncpa [#allocation3], 0  ;;  %s1361_s0 = inlined_call_operand.vmem [shape: f32[2,4,256], index: 0, kind: input, shape index: {}]   ;;  %s1362_s1 = inlined_call_operand.vmem [shape: f32[2,256], index: 1, kind: input, shape index: {}]   ;;  %s1363_s2 = inlined_call_operand.vmem [shape: f32[8,36], index: 2, kind: input, shape index: {}]   ;;  %s1364_s3 = inlined_call_operand.vmem [shape: f32[8,1], index: 3, kind: input, shape index: {}]   ;;  %s1365_s4 = inlined_call_operand.vmem [shape: f32[8,1], index: 4, kind: input, shape index: {}]   ;;  %s1366_s5 = inlined_call_operand.vmem [shape: f32[8,72], index: 5, kind: input, shape index: {}]   ;;  %s1367_s6 = inlined_call_operand.vmem [shape: f32[8,1], index: 6, kind: input, shape index: {}]   ;;  %s1368_s7 = inlined_call_operand.vmem [shape: f32[8,1], index: 7, kind: input, shape index: {}]   ;;  %s1369_s8 = inlined_call_operand.hbm [shape: f32[2,8,256], index: 8, kind: output, shape index: {}]  }
   0x1   :  { %15 = vsyncpa [#allocation3 + $0x1], 0  ;;  %s1090_s27 = smov 0   ;;  %s1092_s28 = smov 0  }
   0x2   :  { %s1094_s29 = smov 0   ;;  %s1096_s30 = smov 0  }
   0x3 LB: > { %s1111_s9 = sadd.s32 4294967295, %s1031_s30   ;;  %s898_s10 = sadd.s32 4294967294, %s1031_s30   ;;  %s1031_s30 = sphi %s1096_s30, %s1375_s30   ;;  %s1027_s29 = sphi %s1094_s29, %s1374_s29   ;;  %s1023_s28 = sphi %s1092_s28, %s1373_s28   ;;  %s1019_s27 = sphi %s1090_s27, %s1372_s27  }
   0x4   : > { %s1115_s11 = sadd.s32 1, %s1031_s30   ;;  %s201_s12 = sadd.s32 1, %s1027_s29 }
   0x5   : > { %s198_s13 = ssub.s32 %s1031_s30, %s1115_s11  ;;  %p211_p0 = scmp.ne.s32.totalorder %s1027_s29, %s1023_s28 }
   0x6   : > { %p199_p1 = scmp.eq.s32.totalorder %s198_s13, 0  ;;  %p212_p2 = scmp.eq.s32.totalorder %s1111_s9, 1 }
   0x7   : > { %p217_p3 = scmp.ne.s32.totalorder %s1023_s28, %s1019_s27  ;;  %p218_p4 = scmp.eq.s32.totalorder %s898_s10, 1 }
   0x8   : > { %s1126_s14 = scalar_select %p199_p1, %s1027_s29, %s201_s12  }
   0x9   : > { %p1128_p5 = por %p212_p2, %p211_p0  ;;  %p1132_p6 = por %p218_p4, %p217_p3 }
   0xa   : > { %p901_p7 = scmp.ge.s32.totalorder %s1031_s30, 1  ;;  %p265_p8 = scmp.lt.s32.totalorder %s1031_s30, 3 }
   0xc   : > { %p266_p9 = pnand %p901_p7, %p265_p8 }
   0xd   : > { %p299_p10 = scmp.lt.s32.totalorder (!%p266_p9), %s1111_s9, 1  ;;  %s1033_s24 = smov (!%p266_p9), 17  }
   0xe   : > { %269 = sbr.rel (%p266_p9) target bundleno = 1000 (0x3e8), region = 52  ;;  %s1034_s25 = smov (!%p266_p9), 111  }
   0xf   : > { %s1035_s26 = smov (!%p266_p9), 95   ;;  %s1036_s10 = smov (!%p266_p9), 127  }
  0x10   : > { %s1037_s12 = smov (!%p266_p9), 94   ;;  %s1038_s13 = smov (!%p266_p9), 96  }
  0x11   : > { %s1040_s18 = smov (!%p266_p9), 110   ;;  %s1041_s19 = smov (!%p266_p9), 112  }
  0x13   : > { %v319_v0 = vlaneseq  ;;  %s300_s17 = scalar_select %p299_p10, %s1111_s9, 1  ;;  %v304_v2 = vld [vmem:[%s1362_s1] sm:$0xf]  ;;  %vm312_vm0 = vcmask 138240   ;;  %v1042_v45 = vmov 0.0   ;;  %v1043_v47 = vmov 0  }
  0x14   : > { %571 = vmatprep.mubr.f32.mxu0 %v1042_v45  ;;  %793 = vmatprep.mubr.f32.mxu1 %v1042_v45  ;;  %v586_v49 = vld [vmem:[%s1365_s4] sm:$0xff]  ;;  %vm486_vm1 = vcmask 769024   ;;  %vm464_vm2 = vcmask 785408   ;;  %vm489_vm3 = vcmask 1043456   ;;  %vm475_vm4 = vcmask 777216   ;;  %vm908_vm13 = vmneg %vm312_vm0 }
  0x15   : > { %v320_v1 = vshrl.u32 %v319_v0, 7  ;;  %s916_s20 = sshll.u32 %s300_s17, 3  ;;  %s1039_s17 = smov 126   ;;  %969 = vset.pattern.permute.xlu1 %v1043_v47  ;;  %968 = vset.pattern.permute.xlu0 %v1043_v47  ;;  %v578_v50 = vld [vmem:[%s1364_s3] sm:$0xff]  ;;  %vm453_vm5 = vcmask 900096   ;;  %vm439_vm6 = vcmask 908288  }
  0x16   : > { %s303_s23 = scalar_lea.vmem %s1361_s0, %s916_s20  ;;  %vm428_vm7 = vcmask 916480   ;;  %vm412_vm8 = vcmask 1031168   ;;  %vm399_vm9 = vcmask 1039360   ;;  %vm499_vm10 = vcmask 293888  }
  0x17   : > { %v321_v3 = vsub.s32 0, %v320_v1  ;;  %v325_v4 = vsub.s32 2, %v320_v1  ;;  %v355_v5 = vsub.s32 1, %v320_v1  ;;  %v359_v6 = vsub.s32 3, %v320_v1  ;;  %v305_v7 = vld [vmem:[%s303_s23] sm:$0xff] }
  0x18   : > { %308 = vrot.lane.b32.xlu0 %v305_v7, %s1033_s24  ;;  %v307_v12 = vcombine.high %v305_v7, %v305_v7  ;;  %vm725_vm14 = vcmask 588800  }
  0x19   : > { %v322_v8 = vrot.slane %v304_v2, %v321_v3  ;;  %v326_v9 = vrot.slane %v304_v2, %v325_v4  ;;  %v356_v10 = vrot.slane %v304_v2, %v355_v5  ;;  %v360_v11 = vrot.slane %v304_v2, %v359_v6 }
  0x1b   : > { %v1147_v13 = vrot.slane %v322_v8, %v321_v3  ;;  %v1149_v14 = vrot.slane %v326_v9, %v321_v3  ;;  %v1151_v15 = vrot.slane %v356_v10, %v355_v5  ;;  %v1153_v16 = vrot.slane %v360_v11, %v355_v5 }
  0x1c   : > { %310 = vrot.lane.b32.xlu0 %v307_v12, %s1033_s24 }
  0x1d   : > { %v339_v17 = vcombine.low %v1147_v13, %v1149_v14  ;;  %v373_v18 = vcombine.low %v1151_v15, %v1153_v16 }
  0x1f   : > { %v341_v19 = vmul.f32 %v339_v17, %v305_v7  ;;  %v375_v20 = vmul.f32 %v373_v18, %v305_v7 }
  0x21   : > { %344 = vrot.lane.b32.xlu1 %v341_v19, %s1033_s24  ;;  %v343_v21 = vcombine.high %v341_v19, %v341_v19  ;;  %378 = vrot.lane.b32.xlu0 %v375_v20, %s1033_s24  ;;  %v377_v22 = vcombine.high %v375_v20, %v375_v20 }
  0x25   : > { %346 = vrot.lane.b32.xlu1 %v343_v21, %s1033_s24 }
  0x29   : > { %380 = vrot.lane.b32.xlu1 %v377_v22, %s1033_s24 }
  0x8a   : > { %v309_v23 = vpop.permute.xlu0 %308 }
  0x8b   : > { %v316_v24 = vsel %vm312_vm0, 0.0, %v309_v23 }
  0x8c   : > { %v390_v25 = vrot.slane %v316_v24, 4  ;;  %433 = vrot.lane.b32.xlu1 %v316_v24, %s1034_s25 }
  0x8e   : > { %469 = vrot.lane.b32.xlu0 %v390_v25, %s1035_s26  ;;  %v311_v26 = vpop.permute.xlu0 %310 }
  0x8f   : > { %v313_v27 = vsel %vm312_vm0, %v309_v23, %v311_v26  ;;  %v317_v28 = vsel %vm312_vm0, %v311_v26, 0.0 }
  0x90   : > { %435 = vrot.lane.b32.xlu1 %v313_v27, %s1034_s25  ;;  %v392_v29 = vrot.slane %v317_v28, 4  ;;  %v391_v31 = vrot.slane %v313_v27, 4 }
  0x92   : > { %437 = vrot.lane.b32.xlu0 %v317_v28, %s1034_s25 }
  0x93   : > { %v345_v30 = vpop.permute.xlu1 %344  ;;  %v379_v32 = vpop.permute.xlu0 %378 }
  0x94   : > { %473 = vrot.lane.b32.xlu1 %v392_v29, %s1035_s26  ;;  %v351_v33 = vsel %vm312_vm0, 0.0, %v345_v30  ;;  %v1176_v35 = vsel %vm312_vm0, 0.0, %v379_v32 }
  0x95   : > { %v444_v40 = vrot.slane %v351_v33, 4  ;;  %v419_v42 = vrot.slane %v1176_v35, 4 }
  0x96   : > { %471 = vrot.lane.b32.xlu0 %v391_v31, %s1035_s26 }
  0x97   : > { %v347_v34 = vpop.permute.xlu1 %346 }
  0x98   : > { %395 = vrot.lane.b32.xlu1 %v391_v31, %s1036_s10  ;;  %v348_v36 = vsel %vm312_vm0, %v345_v30, %v347_v34  ;;  %v352_v39 = vsel %vm312_vm0, %v347_v34, 0.0 }
  0x99   : > { %v445_v43 = vrot.slane %v348_v36, 4  ;;  %v446_v44 = vrot.slane %v352_v39, 4 }
  0x9a   : > { %480 = vrot.lane.b32.xlu0 %v351_v33, %s1037_s12 }
  0x9b   : > { %v381_v37 = vpop.permute.xlu1 %380 }
  0x9c   : > { %458 = vrot.lane.b32.xlu1 %v1176_v35, %s1038_s13  ;;  %v1185_v38 = vsel %vm312_vm0, %v379_v32, %v381_v37  ;;  %v387_v41 = vsel %vm312_vm0, %v381_v37, 0.0 }
  0x9d   : > { %v420_v46 = vrot.slane %v1185_v38, 4  ;;  %v421_v48 = vrot.slane %v387_v41, 4 }
  0x9e   : > { %482 = vrot.lane.b32.xlu0 %v348_v36, %s1037_s12 }
  0xa0   : > { %406 = vrot.lane.b32.xlu1 %v351_v33, %s1039_s17 }
  0xa2   : > { %460 = vrot.lane.b32.xlu0 %v1185_v38, %s1038_s13 }
  0xa4   : > { %484 = vrot.lane.b32.xlu1 %v352_v39, %s1037_s12 }
  0xa6   : > { %447 = vrot.lane.b32.xlu0 %v444_v40, %s1040_s18  ;;  %v498_v40 = vld [vmem:[%s1363_s2] sm:$0xff] }
  0xa8   : > { %462 = vrot.lane.b32.xlu1 %v387_v41, %s1038_s13 }
  0xaa   : > { %410 = vrot.lane.b32.xlu0 %v352_v39, %s1039_s17 }
  0xac   : > { %408 = vrot.lane.b32.xlu1 %v348_v36, %s1039_s17 }
  0xae   : > { %422 = vrot.lane.b32.xlu0 %v419_v42, %s1041_s19 }
  0xb0   : > { %449 = vrot.lane.b32.xlu1 %v445_v43, %s1040_s18 }
  0xb2   : > { %451 = vrot.lane.b32.xlu0 %v446_v44, %s1040_s18 }
  0xb4   : > { %424 = vrot.lane.b32.xlu1 %v420_v46, %s1041_s19 }
  0xb6   : > { %426 = vrot.lane.b32.xlu0 %v421_v48, %s1041_s19 }
  0xb8   : > { %393 = vrot.lane.b32.xlu1 %v390_v25, %s1036_s10 }
  0xba   : > { %397 = vrot.lane.b32.xlu0 %v392_v29, %s1036_s10 }
  0xbc   : > { %589 = vperm.xlu1 %969, %v586_v49  }
  0xbe   : > { %581 = vperm.xlu0 %968, %v578_v50  }
  0xfe   : > { %v434_v51 = vpop.permute.xlu1 %433 }
 0x100   : > { %v470_v52 = vpop.permute.xlu0 %469 }
 0x102   : > { %v436_v53 = vpop.permute.xlu1 %435 }
 0x103   : > { %v440_v22 = vsel %vm439_vm6, %v434_v51, %v436_v53 }
 0x104   : > { %v438_v54 = vpop.permute.xlu0 %437 }
 0x105   : > { %v441_v20 = vsel %vm439_vm6, %v436_v53, %v438_v54 }
 0x106   : > { %v474_v55 = vpop.permute.xlu1 %473 }
 0x108   : > { %v472_v56 = vpop.permute.xlu0 %471 }
 0x109   : > { %v477_v5 = vsel %vm475_vm4, %v472_v56, %v474_v55  ;;  %v476_v7 = vsel %vm475_vm4, %v470_v52, %v472_v56 }
 0x10a   : > { %v396_v57 = vpop.permute.xlu1 %395 }
 0x10c   : > { %v481_v58 = vpop.permute.xlu0 %480 }
 0x10e   : > { %v459_v59 = vpop.permute.xlu1 %458 }
 0x110   : > { %v483_v60 = vpop.permute.xlu0 %482 }
 0x111   : > { %v487_v2 = vsel %vm486_vm1, %v481_v58, %v483_v60 }
 0x112   : > { %v407_v61 = vpop.permute.xlu1 %406 }
 0x114   : > { %v461_v62 = vpop.permute.xlu0 %460 }
 0x115   : > { %v465_v3 = vsel %vm464_vm2, %v459_v59, %v461_v62 }
 0x116   : > { %v485_v63 = vpop.permute.xlu1 %484  ;;  %v496_v10 = vsel %vm489_vm3, %v465_v3, %v476_v7  ;;  %v808_v3 = vld [vmem:[%s1368_s7] sm:$0xff] }
 0x117   : > { %v488_v0 = vsel %vm486_vm1, %v483_v60, %v485_v63 }
 0x118   : > { %905 = vmatprep.subr.msk.mxu0 %vm489_vm3, %v488_v0  ;;  %v448_v1 = vpop.permute.xlu0 %447 }
 0x119   : > { %906 = vmatpush1.msk.msra.mxu0 %vm489_vm3, %v487_v2 }
 0x11a   : > { %v463_v4 = vpop.permute.xlu1 %462 }
 0x11b   : > { %v466_v6 = vsel %vm464_vm2, %v461_v62, %v463_v4  ;;  %v800_v4 = vld [vmem:[%s1367_s6] sm:$0xff] }
 0x11c   : > { %v411_v8 = vpop.permute.xlu0 %410  ;;  %v497_v9 = vsel %vm489_vm3, %v466_v6, %v477_v5 }
 0x11d   : > { %531 = vmatprep.subr.mxu0 %v497_v9 }
 0x11e   : > { %v409_v11 = vpop.permute.xlu1 %408  ;;  %532 = vmatpush1.msra.mxu0 %v496_v10 }
 0x11f   : > { %v414_v28 = vsel %vm412_vm8, %v409_v11, %v411_v8  ;;  %v413_v30 = vsel %vm412_vm8, %v407_v61, %v409_v11 }
 0x120   : > { %v423_v12 = vpop.permute.xlu0 %422 }
 0x122   : > { %v450_v17 = vpop.permute.xlu1 %449 }
 0x123   : > { %v454_v18 = vsel %vm453_vm5, %v448_v1, %v450_v17 }
 0x124   : > { %v452_v19 = vpop.permute.xlu0 %451  ;;  %v494_v25 = vsel %vm489_vm3, %v440_v22, %v454_v18 }
 0x125   : > { %v455_v21 = vsel %vm453_vm5, %v450_v17, %v452_v19 }
 0x126   : > { %v425_v23 = vpop.permute.xlu1 %424  ;;  %v495_v24 = vsel %vm489_vm3, %v441_v20, %v455_v21 }
 0x127   : > { %533 = vmatprep.subr.mxu0 %v495_v24  ;;  %v429_v26 = vsel %vm428_vm7, %v423_v12, %v425_v23 }
 0x128   : > { %534 = vmatpush1.msra.mxu0 %v494_v25  ;;  %v427_v27 = vpop.permute.xlu0 %426  ;;  %v492_v33 = vsel %vm489_vm3, %v413_v30, %v429_v26 }
 0x129   : > { %v430_v29 = vsel %vm428_vm7, %v425_v23, %v427_v27 }
 0x12a   : > { %v394_v31 = vpop.permute.xlu1 %393  ;;  %v493_v32 = vsel %vm489_vm3, %v414_v28, %v430_v29 }
 0x12b   : > { %535 = vmatprep.subr.mxu0 %v493_v32  ;;  %v400_v34 = vsel %vm399_vm9, %v394_v31, %v396_v57 }
 0x12c   : > { %536 = vmatpush1.msra.mxu0 %v492_v33  ;;  %v398_v36 = vpop.permute.xlu0 %397  ;;  %v490_v41 = vsel %vm489_vm3, %v1176_v35, %v400_v34 }
 0x12d   : > { %v401_v37 = vsel %vm399_vm9, %v396_v57, %v398_v36 }
 0x12e   : > { %v491_v39 = vsel %vm489_vm3, %v1185_v38, %v401_v37 }
 0x12f   : > { %537 = vmatprep.subr.mxu0 %v491_v39 }
 0x130   : > { %538 = vmatpush1.msra.mxu0 %v490_v41 }
 0x131   : > { %907 = vmatmul.mubr.msk.f32.vlgmr.msra.gmra.mxu0 %vm499_vm10, %v498_v40 }
 0x137   : > { %v590_v44 = vpop.permute.xlu1 %589 }
 0x139   : > { %v582_v42 = vpop.permute.xlu0 %581 }
 0x1f1   : > { %v573_v43 = vpop.f32.mrf.mxu0 }
 0x1f2   : > { %v584_v45 = vmul.f32 %v582_v42, %v573_v43 }
 0x1f3   : > { %v575_v46 = vpop.f32.mrf.mxu0 }
 0x1f4   : > { %v592_v47 = vadd.f32 %v590_v44, %v584_v45  ;;  %v585_v48 = vmul.f32 %v582_v42, %v575_v46 }
 0x1f6   : > { %v593_v49 = vadd.f32 %v590_v44, %v585_v48  ;;  %vm594_vm11 = vcmp.ge.f32.partialorder %v592_v47, 0.0  ;;  %v596_v38 = vmul.f32 0.01, %v592_v47 }
 0x1f8   : > { %v598_v50 = vsel %vm594_vm11, %v592_v47, %v596_v38  ;;  %vm595_vm12 = vcmp.ge.f32.partialorder %v593_v49, 0.0  ;;  %v597_v51 = vmul.f32 0.01, %v593_v49 }
 0x1f9   : > { %602 = vrot.lane.b32.xlu1 %v598_v50, %s1033_s24  ;;  %v611_v35 = vmul.f32 %v598_v50, %v1147_v13  ;;  %v624_v54 = vmul.f32 %v598_v50, %v1151_v15  ;;  %v724_v50 = vld [vmem:[%s1366_s5] sm:$0xff] }
 0x1fa   : > { %v599_v52 = vsel %vm595_vm12, %v593_v49, %v597_v51 }
 0x1fb   : > { %604 = vrot.lane.b32.xlu0 %v599_v52, %s1033_s24  ;;  %v612_v53 = vmul.f32 %v599_v52, %v1149_v14  ;;  %v625_v55 = vmul.f32 %v599_v52, %v1153_v16 }
 0x1fd   : > { %615 = vrot.lane.b32.xlu1 %v611_v35, %s1033_s24 }
 0x1ff   : > { %617 = vrot.lane.b32.xlu0 %v612_v53, %s1033_s24 }
 0x201   : > { %628 = vrot.lane.b32.xlu1 %v624_v54, %s1033_s24 }
 0x203   : > { %630 = vrot.lane.b32.xlu0 %v625_v55, %s1033_s24 }
 0x26b   : > { %v603_v56 = vpop.permute.xlu1 %602 }
 0x26c   : > { %v609_v57 = vsel %vm312_vm0, 0.0, %v603_v56 }
 0x26d   : > { %v605_v58 = vpop.permute.xlu0 %604  ;;  %704 = vrot.lane.b32.xlu0 %v609_v57, %s1035_s26  ;;  %674 = vrot.lane.b32.xlu1 %v609_v57, %s1034_s25 }
 0x26e   : > { %v606_v14 = vsel %vm312_vm0, %v603_v56, %v605_v58  ;;  %v610_v15 = vsel %vm312_vm0, %v605_v58, 0.0 }
 0x26f   : > { %v616_v13 = vpop.permute.xlu1 %615 }
 0x270   : > { %v622_v59 = vsel %vm312_vm0, 0.0, %v616_v13 }
 0x271   : > { %706 = vrot.lane.b32.xlu0 %v606_v14, %s1035_s26  ;;  %714 = vrot.lane.b32.xlu1 %v622_v59, %s1037_s12  ;;  %v618_v61 = vpop.permute.xlu0 %617 }
 0x272   : > { %v623_v62 = vsel %vm312_vm0, %v618_v61, 0.0  ;;  %v619_v63 = vsel %vm312_vm0, %v616_v13, %v618_v61 }
 0x273   : > { %v1260_v16 = vpop.permute.xlu1 %628 }
 0x274   : > { %v636_v60 = vsel %vm312_vm0, 0.0, %v1260_v16 }
 0x275   : > { %684 = vrot.lane.b32.xlu0 %v622_v59, %s1040_s18  ;;  %708 = vrot.lane.b32.xlu1 %v610_v15, %s1035_s26  ;;  %v631_v0 = vpop.permute.xlu0 %630 }
 0x276   : > { %v637_v1 = vsel %vm312_vm0, %v631_v0, 0.0  ;;  %v1279_v2 = vsel %vm312_vm0, %v1260_v16, %v631_v0 }
 0x279   : > { %678 = vrot.lane.b32.xlu0 %v610_v15, %s1034_s25  ;;  %694 = vrot.lane.b32.xlu1 %v636_v60, %s1038_s13 }
 0x27d   : > { %664 = vrot.lane.b32.xlu0 %v636_v60, %s1041_s19  ;;  %676 = vrot.lane.b32.xlu1 %v606_v14, %s1034_s25 }
 0x281   : > { %642 = vrot.lane.b32.xlu0 %v606_v14, %s1036_s10  ;;  %652 = vrot.lane.b32.xlu1 %v622_v59, %s1039_s17 }
 0x285   : > { %718 = vrot.lane.b32.xlu0 %v623_v62, %s1037_s12  ;;  %716 = vrot.lane.b32.xlu1 %v619_v63, %s1037_s12 }
 0x289   : > { %698 = vrot.lane.b32.xlu0 %v637_v1, %s1038_s13  ;;  %696 = vrot.lane.b32.xlu1 %v1279_v2, %s1038_s13 }
 0x28d   : > { %686 = vrot.lane.b32.xlu0 %v619_v63, %s1040_s18  ;;  %688 = vrot.lane.b32.xlu1 %v623_v62, %s1040_s18 }
 0x291   : > { %666 = vrot.lane.b32.xlu0 %v1279_v2, %s1041_s19  ;;  %668 = vrot.lane.b32.xlu1 %v637_v1, %s1041_s19  ;;  %s917_s19 = sshll.u32 %s1111_s9, 8  ;;  %s1044_s9 = smov [#allocation2]  }
 0x292   : > { %s1326_s24 = scalar_lea.hbm %s1369_s8, %s917_s19  ;;  %s975_s12 = sshll.u32 %s1044_s9, 4  ;;  %s976_s12 = int_to_ptr.vmem [resolvable:$false] %s975_s12 }
 0x295   : > { %656 = vrot.lane.b32.xlu0 %v623_v62, %s1039_s17  ;;  %654 = vrot.lane.b32.xlu1 %v619_v63, %s1039_s17  ;;  %s296_s17 = sand.u32 1, %s1023_s28  }
 0x296   : > { %s902_s18 = sshll.u32 %s296_s17, 4  ;;  %s825_s25 = scalar_lea.sflag [#allocation3], %s296_s17 }
 0x297   : > { %s298_s22 = scalar_lea.vmem [#allocation2], %s902_s18 }
 0x298   : > { %s839_s23 = sshll.u32 %s298_s22, 4  ;;  %s840_s23 = int_to_ptr.vmem [resolvable:$true] %s839_s23 }
 0x299   : > { %640 = vrot.lane.b32.xlu0 %v609_v57, %s1036_s10  ;;  %644 = vrot.lane.b32.xlu1 %v610_v15, %s1036_s10  ;;  %s971_s26 = scalar_lea.vmem %s840_s23, 256  ;;  %s977_s10 = scalar_lea.vmem %s976_s12, 512 }
 0x29a   : > { %p972_p11 = scmp.ne.s32.totalorder %s840_s23, %s971_s26  ;;  %p978_p0 = scmp.lt.s32.totalorder %s840_s23, %s976_s12 }
 0x29b   : > { %p979_p1 = scmp.lt.s32.totalorder %s977_s10, %s971_s26 }
 0x29c   : > { %p973_p12 = pnand %p972_p11, %p1128_p5 }
 0x29d   : > { %811 = vperm.xlu0 %968, %v808_v3   ;;  %803 = vperm.xlu1 %969, %v800_v4   ;;  %p980_p2 = por %p979_p1, %p978_p0 }
 0x29e   : > { %p974_p13 = pneg %p973_p12 }
 0x2a0   : > { %p981_p3 = pnand %p980_p2, %p974_p13 }
 0x2df   : > { %v705_v5 = vpop.permute.xlu0 %704  ;;  %v675_v6 = vpop.permute.xlu1 %674 }
 0x2e3   : > { %v707_v7 = vpop.permute.xlu0 %706  ;;  %v715_v8 = vpop.permute.xlu1 %714 }
 0x2e4   : > { %v710_v28 = vsel %vm475_vm4, %v705_v5, %v707_v7 }
 0x2e7   : > { %v685_v9 = vpop.permute.xlu0 %684  ;;  %v709_v10 = vpop.permute.xlu1 %708 }
 0x2e8   : > { %v711_v25 = vsel %vm475_vm4, %v707_v7, %v709_v10 }
 0x2eb   : > { %v679_v11 = vpop.permute.xlu0 %678  ;;  %v695_v12 = vpop.permute.xlu1 %694 }
 0x2ef   : > { %v665_v17 = vpop.permute.xlu0 %664  ;;  %v677_v18 = vpop.permute.xlu1 %676 }
 0x2f0   : > { %v681_v36 = vsel %vm439_vm6, %v677_v18, %v679_v11  ;;  %v680_v40 = vsel %vm439_vm6, %v675_v6, %v677_v18 }
 0x2f3   : > { %v643_v19 = vpop.permute.xlu0 %642  ;;  %v653_v20 = vpop.permute.xlu1 %652 }
 0x2f7   : > { %v719_v21 = vpop.permute.xlu0 %718  ;;  %v717_v22 = vpop.permute.xlu1 %716 }
 0x2f8   : > { %v721_v23 = vsel %vm486_vm1, %v717_v22, %v719_v21  ;;  %v720_v24 = vsel %vm486_vm1, %v715_v8, %v717_v22 }
 0x2f9   : > { %743 = vmatprep.subr.mxu1 %v721_v23 }
 0x2fa   : > { %744 = vmatpush1.msra.mxu1 %v720_v24 }
 0x2fb   : > { %v699_v26 = vpop.permute.xlu0 %698  ;;  %745 = vmatprep.subr.mxu1 %v711_v25  ;;  %v697_v27 = vpop.permute.xlu1 %696 }
 0x2fc   : > { %746 = vmatpush1.msra.mxu1 %v710_v28  ;;  %v701_v29 = vsel %vm464_vm2, %v697_v27, %v699_v26  ;;  %v700_v30 = vsel %vm464_vm2, %v695_v12, %v697_v27 }
 0x2fd   : > { %747 = vmatprep.subr.mxu1 %v701_v29 }
 0x2fe   : > { %748 = vmatpush1.msra.mxu1 %v700_v30 }
 0x2ff   : > { %v687_v31 = vpop.permute.xlu0 %686  ;;  %v689_v32 = vpop.permute.xlu1 %688 }
 0x300   : > { %v691_v33 = vsel %vm453_vm5, %v687_v31, %v689_v32  ;;  %v690_v34 = vsel %vm453_vm5, %v685_v9, %v687_v31 }
 0x301   : > { %749 = vmatprep.subr.mxu1 %v691_v33 }
 0x302   : > { %750 = vmatpush1.msra.mxu1 %v690_v34 }
 0x303   : > { %v667_v37 = vpop.permute.xlu0 %666  ;;  %751 = vmatprep.subr.mxu1 %v681_v36  ;;  %v669_v39 = vpop.permute.xlu1 %668 }
 0x304   : > { %752 = vmatpush1.msra.mxu1 %v680_v40  ;;  %v671_v41 = vsel %vm428_vm7, %v667_v37, %v669_v39  ;;  %v670_v42 = vsel %vm428_vm7, %v665_v17, %v667_v37 }
 0x305   : > { %753 = vmatprep.subr.mxu1 %v671_v41 }
 0x306   : > { %754 = vmatpush1.msra.mxu1 %v670_v42 }
 0x307   : > { %v657_v43 = vpop.permute.xlu0 %656  ;;  %v655_v44 = vpop.permute.xlu1 %654 }
 0x308   : > { %v659_v45 = vsel %vm412_vm8, %v655_v44, %v657_v43  ;;  %v658_v46 = vsel %vm412_vm8, %v653_v20, %v655_v44 }
 0x309   : > { %755 = vmatprep.subr.mxu1 %v659_v45 }
 0x30a   : > { %756 = vmatpush1.msra.mxu1 %v658_v46 }
 0x30b   : > { %v641_v47 = vpop.permute.xlu0 %640  ;;  %v645_v48 = vpop.permute.xlu1 %644 }
 0x30c   : > { %v647_v49 = vsel %vm399_vm9, %v643_v19, %v645_v48  ;;  %v646_v38 = vsel %vm399_vm9, %v641_v47, %v643_v19 }
 0x30d   : > { %757 = vmatprep.subr.mxu1 %v647_v49 }
 0x30e   : > { %758 = vmatpush1.msra.mxu1 %v646_v38 }
 0x30f   : > { %759 = vmatprep.subr.mxu1 %v1279_v2 }
 0x310   : > { %909 = vmatpush1.msk.msra.mxu1 %vm908_vm13, %v1260_v16 }
 0x311   : > { %910 = vmatmul.mubr.msk.f32.vlgmr.msra.gmra.mxu1 %vm725_vm14, %v724_v50 }
 0x318   : > { %v804_v51 = vpop.permute.xlu1 %803  ;;  %v812_v53 = vpop.permute.xlu0 %811 }
 0x3d1   : > { %v795_v52 = vpop.f32.mrf.mxu1 }
 0x3d2   : > { %v806_v35 = vmul.f32 %v804_v51, %v795_v52 }
 0x3d3   : > { %v797_v54 = vpop.f32.mrf.mxu1 }
 0x3d4   : > { %v814_v55 = vadd.f32 %v812_v53, %v806_v35  ;;  %v807_v56 = vmul.f32 %v804_v51, %v797_v54 }
 0x3d6   : > { %vm816_vm15 = vcmp.ge.f32.partialorder %v814_v55, 0.0  ;;  %v818_v57 = vmul.f32 0.01, %v814_v55  ;;  %v815_v58 = vadd.f32 %v812_v53, %v807_v56 }
 0x3d8   : > { %vm817_vm0 = vcmp.ge.f32.partialorder %v815_v58, 0.0  ;;  %v819_v13 = vmul.f32 0.01, %v815_v58  ;;  %v820_v14 = vsel %vm816_vm15, %v814_v55, %v818_v57 }
 0x3d9   : > { %822 = vst [vmem:[%s298_s22] sm:$0xff] %v820_v14 }
 0x3da   : > { %v821_v59 = vsel %vm817_vm0, %v815_v58, %v819_v13 }
 0x3db   : > { %823 = vst [vmem:[%s298_s22 + $0x8] sm:$0xff] %v821_v59 }
 0x3dc   : > { %984 = shalt.err (!%p981_p3)
}
 0x3dd   : > { %s985_s13 = scalar_lea.hbm %s1326_s24, 256  ;;  %s989_s19 = scalar_lea.hbm %s1369_s8, 512 }
 0x3de   : > { %p986_p4 = scmp.ne.s32.totalorder %s1326_s24, %s985_s13  ;;  %p990_p9 = scmp.lt.s32.totalorder %s1326_s24, %s1369_s8 }
 0x3df   : > { %p991_p10 = scmp.lt.s32.totalorder %s989_s19, %s985_s13 }
 0x3e0   : > { %p987_p7 = pnand %p986_p4, %p1128_p5 }
 0x3e1   : > { %p992_p11 = por %p991_p10, %p990_p9 }
 0x3e2   : > { %p988_p8 = pneg %p987_p7 }
 0x3e4   : > { %p993_p12 = pnand %p992_p11, %p988_p8 }
 0x3e6   : > { %996 = shalt.err (!%p993_p12)
}
 0x3e7   : > { %918 = dma.vmem_to_hbm [thread:$0]  (%p1128_p5), %s840_s23, 256, %s1326_s24, %s825_s25  }
 0x3e8 PF: > { %p924_p13 = scmp.ge.s32.totalorder %s1031_s30, 2  ;;  %s851_s21 = sand.u32 1, %s1019_s27  }
 0x3e9   : > { %s852_s26 = scalar_lea.sflag [#allocation3], %s851_s21 }
 0x3ea   : > { %p921_p0 = pnand %p924_p13, %p1132_p6 }
 0x3ec   : > { %p922_p1 = pneg %p921_p0 }
 0x3ee   : > { %1014 = dma.done.wait (%p922_p1), %s852_s26, 256  }
 0x3ef   : > { %1016 = vsyncadd (%p922_p1), %s852_s26, 4294967040  ;;  %p18_p2 = scmp.ge.s32.totalorder %s1115_s11, 4   ;;  %s1372_s27 = smov %s1023_s28 }
 0x3f0   : > { %s1373_s28 = smov %s1027_s29  ;;  %s1374_s29 = smov %s1126_s14 }
 0x3f1   : > { %s1375_s30 = smov %s1115_s11  ;;  %20 = sbr.rel (!%p18_p2) target bundleno = 3 (0x3), region = 87 }
 0x3f6   :  { %857 = vsyncpa [#allocation3], 1 }
 0x3f7   :  { %859 = vsyncpa [#allocation3 + $0x1], 1 }

</bundles_post_ra>
